<compile_context>
chip_gen: v5e
topology: v5e:2x2
jax: 0.10.0
libtpu: 0.0.40
codegen_flags: <defaults>
</compile_context>

<pallas_src>
import functools

import numpy as np
import jax
import jax.numpy as jnp
from jax.experimental import pallas as pl
from jax.experimental.pallas import tpu as pltpu

LOG_2PI = float(np.log(2.0 * np.pi))


# --------------------------------------------------------------------------
# forward():  V = eps * softplus(V_)
# --------------------------------------------------------------------------
def dirniw_forward(m, v_raw, eps):
    """DirNIWNet.forward(): (prior mean, eps * softplus(prior raw covariance)).

    A (p, d) elementwise op is microseconds of work; a dedicated pallas_call is
    pure dispatch overhead (perf review), so this stays in plain jnp.
    """
    return m, eps * jax.nn.softplus(v_raw)


# --------------------------------------------------------------------------
# Fused MAP-EM kernel: all iterations + all token tiles in one pallas_call.
# --------------------------------------------------------------------------
def _em_kernel(tau, d, p,
               data_ref, mask_ref, m_ref, v_ref,          # inputs
               pi_ref, mu_ref, sig_ref, qq_ref,           # outputs (pi/mu/sig resident)
               wsum_ref, wx_ref):                         # VMEM scratch accumulators
    it = pl.program_id(1)
    nt = pl.program_id(2)
    n_nt = pl.num_programs(2)

    # Initialize the mixture to the prior mode at the start of each bag.
    @pl.when((it == 0) & (nt == 0))
    def _init():
        pi_ref[0] = jnp.full((p, 1), 1.0 / p, jnp.float32)
        mu_ref[0] = m_ref[...]
        sig_ref[0] = v_ref[...]

    # Zero the sufficient-statistic accumulators at the start of each EM iter.
    @pl.when(nt == 0)
    def _zero():
        wsum_ref[...] = jnp.zeros_like(wsum_ref)
        wx_ref[...] = jnp.zeros_like(wx_ref)

    x = data_ref[0]                                  # (tn, d)
    msk = mask_ref[0]                                # (1, tn)  lane-dense mask row
    x2 = x * x                                       # hoisted: reused by E- and M-step
    xcat = jnp.concatenate([x, x2], axis=-1)         # (tn, 2d)

    pi = pi_ref[0]                                   # (p, 1)
    mu = mu_ref[0]                                   # (p, d)
    sig = sig_ref[0]                                 # (p, d)

    # ------------------ E-step (prototypes on sublanes, tokens on lanes) ----
    inv_sig = 1.0 / sig
    # merged quad - 2*cross in one MXU call: [-2*mu/sig, 1/sig] . [x, x^2]^T
    a_cat = jnp.concatenate([-2.0 * mu * inv_sig, inv_sig], axis=-1)      # (p, 2d)
    const = jnp.sum(jnp.log(sig) + mu * mu * inv_sig, axis=-1,
                    keepdims=True)                                        # (p, 1)
    qf = jnp.einsum('pe,ne->pn', a_cat, xcat,
                    preferred_element_type=jnp.float32)                   # (p, tn)
    jll = -0.5 * (d * LOG_2PI + const + qf) + jnp.log(pi)                 # (p, tn)

    # single-exp softmax over prototypes (8-sublane reduction)
    m_max = jnp.max(jll, axis=0, keepdims=True)                           # (1, tn)
    e = jnp.exp(jll - m_max)                                              # (p, tn)
    s = jnp.sum(e, axis=0, keepdims=True)                                 # (1, tn)
    qq = e * pl.reciprocal(s, approx=False) * msk                         # (p, tn)

    qq_ref[0] = qq          # lane-dense store (tokens on the lane axis)

    # ------------------ accumulate sufficient statistics --------------------
    wsum_ref[...] += jnp.sum(qq, axis=1, keepdims=True)                   # (p, 1)
    wx_ref[...] += jnp.einsum('pn,ne->pe', qq, xcat,
                              preferred_element_type=jnp.float32)         # (p, 2d)

    # ------------------ M-step at the last token tile of the iteration ------
    @pl.when(nt == n_nt - 1)
    def _mstep():
        m_prior = m_ref[...]
        v_prior = v_ref[...]
        wreg = wsum_ref[...] + tau                                        # (p, 1)
        inv_wreg = pl.reciprocal(wreg, approx=False)
        pi_ref[0] = wreg * pl.reciprocal(
            jnp.sum(wreg, axis=0, keepdims=True), approx=False)           # (p, 1)
        wx = wx_ref[...]
        wxsum = wx[:, :d]
        wxxsum = wx[:, d:]
        mu_new = (wxsum + m_prior * tau) * inv_wreg
        # NOTE: like the PyTorch reference, no variance floor is applied; Sigma
        # can become <= 0 for degenerate inputs (kept for semantic parity).
        sig_new = (wxxsum + (v_prior + m_prior * m_prior) * tau) * inv_wreg \
                  - mu_new * mu_new
        mu_ref[0] = mu_new
        sig_ref[0] = sig_new


def _choose_block_n(N, d, p, vmem_budget_bytes=8 << 20):
    """Pick a token-tile size: full N if it comfortably fits, else a multiple
    of 128 sized to keep double-buffered data/qq tiles + live temporaries well
    inside the scoped VMEM budget on every TPU generation."""
    per_row = 4 * (2 * (d + p + 1) + 3 * d + 2 * p)   # rough f32 bytes per token row
    tn = max(int(vmem_budget_bytes // max(per_row, 1)), 128)
    if tn >= N:
        return N
    return max(128, (tn // 128) * 128)


def dirniw_map_em(data, m, v, mask=None, num_iters=3, tau=1.0, block_n=None):
    """Equivalent of DirNIWNet.map_em() — returns (pi, mu, Sigma, qq)."""
    data = jnp.asarray(data, jnp.float32)
    m = jnp.asarray(m, jnp.float32)
    v = jnp.asarray(v, jnp.float32)
    B, N, d = data.shape
    p = m.shape[0]
    assert num_iters >= 1

    if mask is None:
        mask = jnp.ones((B, N), jnp.float32)
    mask = jnp.asarray(mask, jnp.float32)

    tn = _choose_block_n(N, d, p) if block_n is None else int(block_n)
    tn = min(tn, N)
    if tn >= N:
        tn = N
        n_pad = N
    else:
        tn = max(128, (tn // 128) * 128)
        n_pad = -(-N // tn) * tn
    n_tiles = n_pad // tn

    if n_pad != N:   # pad tokens; padded rows are masked out (contribute 0)
        data = jnp.pad(data, ((0, 0), (0, n_pad - N), (0, 0)))
        mask = jnp.pad(mask, ((0, 0), (0, n_pad - N)))
    mask3 = mask.reshape(B, 1, n_pad)

    kernel = functools.partial(_em_kernel, float(tau), int(d), int(p))

    pi, mu, sigma, qq_t = pl.pallas_call(
        kernel,
        grid=(B, int(num_iters), n_tiles),
        in_specs=[
            pl.BlockSpec((1, tn, d), lambda b, it, nt: (b, nt, 0)),   # data tile
            pl.BlockSpec((1, 1, tn), lambda b, it, nt: (b, 0, nt)),   # mask row
            pl.BlockSpec((p, d), lambda b, it, nt: (0, 0)),           # prior mean m
            pl.BlockSpec((p, d), lambda b, it, nt: (0, 0)),           # prior cov V
        ],
        out_specs=[
            pl.BlockSpec((1, p, 1), lambda b, it, nt: (b, 0, 0)),     # pi   (resident)
            pl.BlockSpec((1, p, d), lambda b, it, nt: (b, 0, 0)),     # mu   (resident)
            pl.BlockSpec((1, p, d), lambda b, it, nt: (b, 0, 0)),     # Sigma(resident)
            pl.BlockSpec((1, p, tn), lambda b, it, nt: (b, 0, nt)),   # qq (lane-dense)
        ],
        out_shape=[
            jax.ShapeDtypeStruct((B, p, 1), jnp.float32),
            jax.ShapeDtypeStruct((B, p, d), jnp.float32),
            jax.ShapeDtypeStruct((B, p, d), jnp.float32),
            jax.ShapeDtypeStruct((B, p, n_pad), jnp.float32),
        ],
        scratch_shapes=[
            pltpu.VMEM((p, 1), jnp.float32),        # wsum accumulator
            pltpu.VMEM((p, 2 * d), jnp.float32),    # [wxsum | wxxsum] accumulator
        ],
        compiler_params=pltpu.CompilerParams(
            dimension_semantics=("parallel", "arbitrary", "arbitrary")),
    )(data, mask3, m, v)

    pi = pi.reshape(B, p)
    qq = qq_t[:, :, :N].transpose(0, 2, 1)   # back to reference (B, N, p) layout
    return pi, mu, sigma, qq


# --------------------------------------------------------------------------
# Pure-JAX reference (mirrors the PyTorch code) for correctness checks.
# --------------------------------------------------------------------------
def _ref_map_em(data, m, v, mask, num_iters=3, tau=1.0):
    B, N, d = data.shape
    p = m.shape[0]
    pi = jnp.full((B, p), 1.0 / p, jnp.float32)
    mu = jnp.tile(m[None], (B, 1, 1))
    sigma = jnp.tile(v[None], (B, 1, 1))
    qq = None
    for _ in range(num_iters):
        jll = -0.5 * (d * LOG_2PI
                      + jnp.sum(jnp.log(sigma), -1)[:, None, :]
                      + jnp.einsum('bnd,bpd->bnp', data ** 2, 1.0 / sigma)
                      + jnp.sum(mu ** 2 / sigma, -1)[:, None, :]
                      - 2.0 * jnp.einsum('bnd,bpd->bnp', data, mu / sigma)) \
              + jnp.log(pi)[:, None, :]
        mll = jax.scipy.special.logsumexp(jll, axis=-1)
        qq = jnp.exp(jll - mll[..., None]) * mask[..., None]
        wsum_reg = jnp.sum(qq, 1) + tau
        wxsum = jnp.einsum('bnp,bnd->bpd', qq, data)
        wxxsum = jnp.einsum('bnp,bnd->bpd', qq, data ** 2)
        pi = wsum_reg / jnp.sum(wsum_reg, 1, keepdims=True)
        mu = (wxsum + m[None] * tau) / wsum_reg[..., None]
        sigma = (wxxsum + (v + m ** 2)[None] * tau) / wsum_reg[..., None] - mu ** 2
    return pi, mu, sigma, qq


def _check(got, ref, name):
    assert np.allclose(np.asarray(got), np.asarray(ref), rtol=3e-3, atol=3e-3), name


# --------------------------------------------------------------------------
if __name__ == "__main__":
    p, d = 8, 32
    eps = 0.1

    key = jax.random.PRNGKey(0)
    k_m, k_x1, k_m1, k_x2, k_m2 = jax.random.split(key, 5)

    # parameter init mirroring __init__ (load_proto=False path)
    m_param = (0.1 * jax.random.normal(k_m, (p, d))).astype(jnp.float32)
    v_raw = jnp.full((p, d), float(np.log(np.e - 1.0)), jnp.float32)

    # ---- forward(): prior mean + eps*softplus covariance ----
    m_prior, V = dirniw_forward(m_param, v_raw, eps)
    V = jax.block_until_ready(V)
    V_ref = eps * (jnp.maximum(v_raw, 0.0) + jnp.log1p(jnp.exp(-jnp.abs(v_raw))))
    _check(V, V_ref, "forward V")

    # ---- Case 1: small bag -> single-tile path (bag read once, qq written once)
    B, N = 2, 64
    data1 = jax.random.normal(k_x1, (B, N, d), jnp.float32)
    mask1 = (jax.random.uniform(k_m1, (B, N)) > 0.2).astype(jnp.float32)
    pi1, mu1, sig1, qq1 = dirniw_map_em(data1, m_prior, V, mask=mask1,
                                        num_iters=3, tau=1.0)
    jax.block_until_ready((pi1, mu1, sig1, qq1))
    r = _ref_map_em(data1, m_prior, V, mask1, num_iters=3, tau=1.0)
    for got, ref, nm in zip((pi1, mu1, sig1, qq1), r, ("pi", "mu", "Sigma", "qq")):
        _check(got, ref, "case1 " + nm)

    # ---- Case 2: force the tiled path (N=320 -> padded to 384, 3 tiles of 128)
    B2, N2 = 2, 320
    data2 = jax.random.normal(k_x2, (B2, N2, d), jnp.float32)
    mask2 = (jax.random.uniform(k_m2, (B2, N2)) > 0.15).astype(jnp.float32)
    pi2, mu2, sig2, qq2 = dirniw_map_em(data2, m_prior, V, mask=mask2,
                                        num_iters=3, tau=1.0, block_n=128)
    jax.block_until_ready((pi2, mu2, sig2, qq2))
    r2 = _ref_map_em(data2, m_prior, V, mask2, num_iters=3, tau=1.0)
    for got, ref, nm in zip((pi2, mu2, sig2, qq2), r2, ("pi", "mu", "Sigma", "qq")):
        _check(got, ref, "case2 " + nm)

    # TODO(synk): unsup_train (spherical k-means over a torch DataLoader) is a
    # host-side training utility with no kernel equivalent; not implemented.
    print("KERNEL_OK")
</pallas_src>

<mosaic_0001>
module attributes {stable_mosaic.version = 11 : i64} {
  func.func @_em_kernel(%arg0: i32, %arg1: i32, %arg2: i32, %arg3: memref<1x64x32xf32, #tpu.memory_space<vmem>>, %arg4: memref<1x1x64xf32, #tpu.memory_space<vmem>>, %arg5: memref<8x32xf32, #tpu.memory_space<vmem>>, %arg6: memref<8x32xf32, #tpu.memory_space<vmem>>, %arg7: memref<1x8x1xf32, #tpu.memory_space<vmem>>, %arg8: memref<1x8x32xf32, #tpu.memory_space<vmem>>, %arg9: memref<1x8x32xf32, #tpu.memory_space<vmem>>, %arg10: memref<1x8x64xf32, #tpu.memory_space<vmem>>, %arg11: memref<8x1xf32, #tpu.memory_space<vmem>>, %arg12: memref<8x64xf32, #tpu.memory_space<vmem>>) attributes {dimension_semantics = [#tpu.dimension_semantics<parallel>, #tpu.dimension_semantics<arbitrary>, #tpu.dimension_semantics<arbitrary>], iteration_bounds = array<i64: 2, 3, 1>, scalar_prefetch = 0 : i64, scratch_operands = 2 : i64, tpu.core_type = #tpu.core_type<tc>, window_params = [{transform_indices = @transform_0, window_bounds = array<i64: 1, 64, 32>}, {transform_indices = @transform_1, window_bounds = array<i64: 1, 1, 64>}, {pipeline_mode = #tpu.pipeline_mode<synchronous>, transform_indices = @transform_2, window_bounds = array<i64: 8, 32>}, {pipeline_mode = #tpu.pipeline_mode<synchronous>, transform_indices = @transform_3, window_bounds = array<i64: 8, 32>}, {transform_indices = @transform_4, window_bounds = array<i64: 1, 8, 1>}, {transform_indices = @transform_5, window_bounds = array<i64: 1, 8, 32>}, {transform_indices = @transform_6, window_bounds = array<i64: 1, 8, 32>}, {transform_indices = @transform_7, window_bounds = array<i64: 1, 8, 64>}]} {
    %c0_i32 = arith.constant 0 : i32
    %0 = arith.cmpi eq, %arg1, %c0_i32 : i32
    %c0_i32_0 = arith.constant 0 : i32
    %1 = arith.cmpi eq, %arg2, %c0_i32_0 : i32
    %2 = arith.andi %0, %1 : i1
    %3 = arith.extui %2 : i1 to i32
    %c0_i32_1 = arith.constant 0 : i32
    %4 = arith.cmpi ne, %3, %c0_i32_1 : i32
    scf.if %4 {
      %cst_40 = arith.constant 1.250000e-01 : f32
      %69 = vector.broadcast %cst_40 : f32 to vector<8x1xf32>
      %c0_41 = arith.constant 0 : index
      %c0_42 = arith.constant 0 : index
      %c0_43 = arith.constant 0 : index
      %70 = vector.load %arg7[%c0_41, %c0_42, %c0_43] : memref<1x8x1xf32, #tpu.memory_space<vmem>>, vector<1x8x1xf32>
      %71 = vector.shape_cast %70 : vector<1x8x1xf32> to vector<8x1xf32>
      %72 = vector.shape_cast %69 : vector<8x1xf32> to vector<1x8x1xf32>
      tpu.vector_store %arg7[%c0_41, %c0_42, %c0_43], %72 {strides = array<i32>} : memref<1x8x1xf32, #tpu.memory_space<vmem>>, vector<1x8x1xf32>,
      %c0_44 = arith.constant 0 : index
      %c0_45 = arith.constant 0 : index
      %73 = vector.load %arg5[%c0_44, %c0_45] : memref<8x32xf32, #tpu.memory_space<vmem>>, vector<8x32xf32>
      %c0_46 = arith.constant 0 : index
      %c0_47 = arith.constant 0 : index
      %c0_48 = arith.constant 0 : index
      %74 = vector.load %arg8[%c0_46, %c0_47, %c0_48] : memref<1x8x32xf32, #tpu.memory_space<vmem>>, vector<1x8x32xf32>
      %75 = vector.shape_cast %74 : vector<1x8x32xf32> to vector<8x32xf32>
      %76 = vector.shape_cast %73 : vector<8x32xf32> to vector<1x8x32xf32>
      tpu.vector_store %arg8[%c0_46, %c0_47, %c0_48], %76 {strides = array<i32>} : memref<1x8x32xf32, #tpu.memory_space<vmem>>, vector<1x8x32xf32>,
      %c0_49 = arith.constant 0 : index
      %c0_50 = arith.constant 0 : index
      %77 = vector.load %arg6[%c0_49, %c0_50] : memref<8x32xf32, #tpu.memory_space<vmem>>, vector<8x32xf32>
      %c0_51 = arith.constant 0 : index
      %c0_52 = arith.constant 0 : index
      %c0_53 = arith.constant 0 : index
      %78 = vector.load %arg9[%c0_51, %c0_52, %c0_53] : memref<1x8x32xf32, #tpu.memory_space<vmem>>, vector<1x8x32xf32>
      %79 = vector.shape_cast %78 : vector<1x8x32xf32> to vector<8x32xf32>
      %80 = vector.shape_cast %77 : vector<8x32xf32> to vector<1x8x32xf32>
      tpu.vector_store %arg9[%c0_51, %c0_52, %c0_53], %80 {strides = array<i32>} : memref<1x8x32xf32, #tpu.memory_space<vmem>>, vector<1x8x32xf32>,
    } else {
    }
    %c0_i32_2 = arith.constant 0 : i32
    %5 = arith.cmpi eq, %arg2, %c0_i32_2 : i32
    %6 = arith.extui %5 : i1 to i32
    %c0_i32_3 = arith.constant 0 : i32
    %7 = arith.cmpi ne, %6, %c0_i32_3 : i32
    scf.if %7 {
      %cst_40 = arith.constant 0.000000e+00 : f32
      %69 = vector.broadcast %cst_40 : f32 to vector<8x1xf32>
      %c0_41 = arith.constant 0 : index
      %c0_42 = arith.constant 0 : index
      %70 = vector.load %arg11[%c0_41, %c0_42] : memref<8x1xf32, #tpu.memory_space<vmem>>, vector<8x1xf32>
      tpu.vector_store %arg11[%c0_41, %c0_42], %69 {strides = array<i32>} : memref<8x1xf32, #tpu.memory_space<vmem>>, vector<8x1xf32>,
      %cst_43 = arith.constant 0.000000e+00 : f32
      %71 = vector.broadcast %cst_43 : f32 to vector<8x64xf32>
      %c0_44 = arith.constant 0 : index
      %c0_45 = arith.constant 0 : index
      %72 = vector.load %arg12[%c0_44, %c0_45] : memref<8x64xf32, #tpu.memory_space<vmem>>, vector<8x64xf32>
      tpu.vector_store %arg12[%c0_44, %c0_45], %71 {strides = array<i32>} : memref<8x64xf32, #tpu.memory_space<vmem>>, vector<8x64xf32>,
    } else {
    }
    %c0 = arith.constant 0 : index
    %c0_4 = arith.constant 0 : index
    %c0_5 = arith.constant 0 : index
    %8 = vector.load %arg3[%c0, %c0_4, %c0_5] : memref<1x64x32xf32, #tpu.memory_space<vmem>>, vector<1x64x32xf32>
    %9 = vector.shape_cast %8 : vector<1x64x32xf32> to vector<64x32xf32>
    %c0_6 = arith.constant 0 : index
    %c0_7 = arith.constant 0 : index
    %c0_8 = arith.constant 0 : index
    %10 = vector.load %arg4[%c0_6, %c0_7, %c0_8] : memref<1x1x64xf32, #tpu.memory_space<vmem>>, vector<1x1x64xf32>
    %11 = vector.shape_cast %10 : vector<1x1x64xf32> to vector<1x64xf32>
    %12 = arith.mulf %9, %9 : vector<64x32xf32>
    %13 = tpu.concatenate %9, %12 in 1 : vector<64x32xf32>, vector<64x32xf32> -> vector<64x64xf32>
    %c0_9 = arith.constant 0 : index
    %c0_10 = arith.constant 0 : index
    %c0_11 = arith.constant 0 : index
    %14 = vector.load %arg7[%c0_9, %c0_10, %c0_11] : memref<1x8x1xf32, #tpu.memory_space<vmem>>, vector<1x8x1xf32>
    %15 = vector.shape_cast %14 : vector<1x8x1xf32> to vector<8x1xf32>
    %c0_12 = arith.constant 0 : index
    %c0_13 = arith.constant 0 : index
    %c0_14 = arith.constant 0 : index
    %16 = vector.load %arg8[%c0_12, %c0_13, %c0_14] : memref<1x8x32xf32, #tpu.memory_space<vmem>>, vector<1x8x32xf32>
    %17 = vector.shape_cast %16 : vector<1x8x32xf32> to vector<8x32xf32>
    %c0_15 = arith.constant 0 : index
    %c0_16 = arith.constant 0 : index
    %c0_17 = arith.constant 0 : index
    %18 = vector.load %arg9[%c0_15, %c0_16, %c0_17] : memref<1x8x32xf32, #tpu.memory_space<vmem>>, vector<1x8x32xf32>
    %19 = vector.shape_cast %18 : vector<1x8x32xf32> to vector<8x32xf32>
    %cst = arith.constant 1.000000e+00 : f32
    %20 = vector.broadcast %cst : f32 to vector<8x32xf32>
    %21 = arith.divf %20, %19 : vector<8x32xf32>
    %cst_18 = arith.constant -2.000000e+00 : f32
    %22 = vector.broadcast %cst_18 : f32 to vector<8x32xf32>
    %23 = arith.mulf %22, %17 : vector<8x32xf32>
    %24 = arith.mulf %23, %21 : vector<8x32xf32>
    %25 = tpu.concatenate %24, %21 in 1 : vector<8x32xf32>, vector<8x32xf32> -> vector<8x64xf32>
    %26 = math.log %19 : vector<8x32xf32>
    %27 = arith.mulf %17, %17 : vector<8x32xf32>
    %28 = arith.mulf %27, %21 : vector<8x32xf32>
    %29 = arith.addf %26, %28 : vector<8x32xf32>
    %cst_19 = arith.constant dense<0.000000e+00> : vector<8xf32>
    %30 = vector.multi_reduction <add>, %29, %cst_19 [1] : vector<8x32xf32> to vector<8xf32>
    %31 = vector.shape_cast %30 : vector<8xf32> to vector<8x1xf32>
    "tpu.trace_start"() <{level = 10 : i32, message = "pe,ne->pn"}> : () -> ()
    %cst_20 = arith.constant dense<0.000000e+00> : vector<8x64xf32>
    %32 = tpu.matmul %25, %13, %cst_20 {dimension_numbers = #tpu.dot_dimension_numbers<[1], [1], [0], [0], [0, 0, 1, 0], [], []>} : vector<8x64xf32>, vector<64x64xf32>, vector<8x64xf32> -> vector<8x64xf32>
    "tpu.trace_stop"() : () -> ()
    %cst_21 = arith.constant 58.8120651 : f32
    %33 = vector.broadcast %cst_21 : f32 to vector<8x1xf32>
    %34 = arith.addf %33, %31 : vector<8x1xf32>
    %35 = vector.broadcast %34 : vector<8x1xf32> to vector<8x64xf32>
    %36 = arith.addf %35, %32 : vector<8x64xf32>
    %cst_22 = arith.constant -5.000000e-01 : f32
    %37 = vector.broadcast %cst_22 : f32 to vector<8x64xf32>
    %38 = arith.mulf %37, %36 : vector<8x64xf32>
    %39 = math.log %15 : vector<8x1xf32>
    %40 = vector.broadcast %39 : vector<8x1xf32> to vector<8x64xf32>
    %41 = arith.addf %38, %40 : vector<8x64xf32>
    %cst_23 = arith.constant dense<0xFF800000> : vector<64xf32>
    %42 = vector.multi_reduction <maximumf>, %41, %cst_23 [0] : vector<8x64xf32> to vector<64xf32>
    %43 = vector.shape_cast %42 : vector<64xf32> to vector<1x64xf32>
    %44 = vector.broadcast %43 : vector<1x64xf32> to vector<8x64xf32>
    %45 = arith.subf %41, %44 : vector<8x64xf32>
    %46 = math.exp %45 : vector<8x64xf32>
    %cst_24 = arith.constant dense<0.000000e+00> : vector<64xf32>
    %47 = vector.multi_reduction <add>, %46, %cst_24 [0] : vector<8x64xf32> to vector<64xf32>
    %48 = vector.shape_cast %47 : vector<64xf32> to vector<1x64xf32>
    %49 = tpu.reciprocal %48 : vector<1x64xf32> -> vector<1x64xf32>
    %50 = vector.broadcast %49 : vector<1x64xf32> to vector<8x64xf32>
    %51 = arith.mulf %46, %50 : vector<8x64xf32>
    %52 = vector.broadcast %11 : vector<1x64xf32> to vector<8x64xf32>
    %53 = arith.mulf %51, %52 : vector<8x64xf32>
    %c0_25 = arith.constant 0 : index
    %c0_26 = arith.constant 0 : index
    %c0_27 = arith.constant 0 : index
    %54 = vector.load %arg10[%c0_25, %c0_26, %c0_27] : memref<1x8x64xf32, #tpu.memory_space<vmem>>, vector<1x8x64xf32>
    %55 = vector.shape_cast %54 : vector<1x8x64xf32> to vector<8x64xf32>
    %56 = vector.shape_cast %53 : vector<8x64xf32> to vector<1x8x64xf32>
    tpu.vector_store %arg10[%c0_25, %c0_26, %c0_27], %56 {strides = array<i32>} : memref<1x8x64xf32, #tpu.memory_space<vmem>>, vector<1x8x64xf32>,
    %c0_28 = arith.constant 0 : index
    %c0_29 = arith.constant 0 : index
    %57 = vector.load %arg11[%c0_28, %c0_29] : memref<8x1xf32, #tpu.memory_space<vmem>>, vector<8x1xf32>
    %cst_30 = arith.constant dense<0.000000e+00> : vector<8xf32>
    %58 = vector.multi_reduction <add>, %53, %cst_30 [1] : vector<8x64xf32> to vector<8xf32>
    %59 = vector.shape_cast %58 : vector<8xf32> to vector<8x1xf32>
    %60 = arith.addf %57, %59 : vector<8x1xf32>
    %c0_31 = arith.constant 0 : index
    %c0_32 = arith.constant 0 : index
    %61 = vector.load %arg11[%c0_31, %c0_32] : memref<8x1xf32, #tpu.memory_space<vmem>>, vector<8x1xf32>
    tpu.vector_store %arg11[%c0_31, %c0_32], %60 {strides = array<i32>} : memref<8x1xf32, #tpu.memory_space<vmem>>, vector<8x1xf32>,
    %c0_33 = arith.constant 0 : index
    %c0_34 = arith.constant 0 : index
    %62 = vector.load %arg12[%c0_33, %c0_34] : memref<8x64xf32, #tpu.memory_space<vmem>>, vector<8x64xf32>
    "tpu.trace_start"() <{level = 10 : i32, message = "pn,ne->pe"}> : () -> ()
    %cst_35 = arith.constant dense<0.000000e+00> : vector<8x64xf32>
    %63 = tpu.matmul %53, %13, %cst_35 {dimension_numbers = #tpu.dot_dimension_numbers<[1], [0], [0], [1], [0, 0, 1, 1], [], []>} : vector<8x64xf32>, vector<64x64xf32>, vector<8x64xf32> -> vector<8x64xf32>
    "tpu.trace_stop"() : () -> ()
    %64 = arith.addf %62, %63 : vector<8x64xf32>
    %c0_36 = arith.constant 0 : index
    %c0_37 = arith.constant 0 : index
    %65 = vector.load %arg12[%c0_36, %c0_37] : memref<8x64xf32, #tpu.memory_space<vmem>>, vector<8x64xf32>
    tpu.vector_store %arg12[%c0_36, %c0_37], %64 {strides = array<i32>} : memref<8x64xf32, #tpu.memory_space<vmem>>, vector<8x64xf32>,
    %c0_i32_38 = arith.constant 0 : i32
    %66 = arith.cmpi eq, %arg2, %c0_i32_38 : i32
    %67 = arith.extui %66 : i1 to i32
    %c0_i32_39 = arith.constant 0 : i32
    %68 = arith.cmpi ne, %67, %c0_i32_39 : i32
    scf.if %68 {
      %c0_40 = arith.constant 0 : index
      %c0_41 = arith.constant 0 : index
      %69 = vector.load %arg5[%c0_40, %c0_41] : memref<8x32xf32, #tpu.memory_space<vmem>>, vector<8x32xf32>
      %c0_42 = arith.constant 0 : index
      %c0_43 = arith.constant 0 : index
      %70 = vector.load %arg6[%c0_42, %c0_43] : memref<8x32xf32, #tpu.memory_space<vmem>>, vector<8x32xf32>
      %c0_44 = arith.constant 0 : index
      %c0_45 = arith.constant 0 : index
      %71 = vector.load %arg11[%c0_44, %c0_45] : memref<8x1xf32, #tpu.memory_space<vmem>>, vector<8x1xf32>
      %cst_46 = arith.constant 1.000000e+00 : f32
      %72 = vector.broadcast %cst_46 : f32 to vector<8x1xf32>
      %73 = arith.addf %71, %72 : vector<8x1xf32>
      %74 = tpu.reciprocal %73 : vector<8x1xf32> -> vector<8x1xf32>
      %cst_47 = arith.constant dense<0.000000e+00> : vector<1xf32>
      %75 = vector.multi_reduction <add>, %73, %cst_47 [0] : vector<8x1xf32> to vector<1xf32>
      %76 = vector.shape_cast %75 : vector<1xf32> to vector<1x1xf32>
      %77 = tpu.reciprocal %76 : vector<1x1xf32> -> vector<1x1xf32>
      %78 = vector.broadcast %77 : vector<1x1xf32> to vector<8x1xf32>
      %79 = arith.mulf %73, %78 : vector<8x1xf32>
      %c0_48 = arith.constant 0 : index
      %c0_49 = arith.constant 0 : index
      %c0_50 = arith.constant 0 : index
      %80 = vector.load %arg7[%c0_48, %c0_49, %c0_50] : memref<1x8x1xf32, #tpu.memory_space<vmem>>, vector<1x8x1xf32>
      %81 = vector.shape_cast %80 : vector<1x8x1xf32> to vector<8x1xf32>
      %82 = vector.shape_cast %79 : vector<8x1xf32> to vector<1x8x1xf32>
      tpu.vector_store %arg7[%c0_48, %c0_49, %c0_50], %82 {strides = array<i32>} : memref<1x8x1xf32, #tpu.memory_space<vmem>>, vector<1x8x1xf32>,
      %c0_51 = arith.constant 0 : index
      %c0_52 = arith.constant 0 : index
      %83 = vector.load %arg12[%c0_51, %c0_52] : memref<8x64xf32, #tpu.memory_space<vmem>>, vector<8x64xf32>
      %84 = vector.extract_strided_slice %83 {offsets = [0, 0], sizes = [8, 32], strides = [1, 1]} : vector<8x64xf32> to vector<8x32xf32>
      %85 = vector.extract_strided_slice %83 {offsets = [0, 32], sizes = [8, 32], strides = [1, 1]} : vector<8x64xf32> to vector<8x32xf32>
      %cst_53 = arith.constant 1.000000e+00 : f32
      %86 = vector.broadcast %cst_53 : f32 to vector<8x32xf32>
      %87 = arith.mulf %69, %86 : vector<8x32xf32>
      %88 = arith.addf %84, %87 : vector<8x32xf32>
      %89 = vector.broadcast %74 : vector<8x1xf32> to vector<8x32xf32>
      %90 = arith.mulf %88, %89 : vector<8x32xf32>
      %91 = arith.mulf %69, %69 : vector<8x32xf32>
      %92 = arith.addf %70, %91 : vector<8x32xf32>
      %cst_54 = arith.constant 1.000000e+00 : f32
      %93 = vector.broadcast %cst_54 : f32 to vector<8x32xf32>
      %94 = arith.mulf %92, %93 : vector<8x32xf32>
      %95 = arith.addf %85, %94 : vector<8x32xf32>
      %96 = vector.broadcast %74 : vector<8x1xf32> to vector<8x32xf32>
      %97 = arith.mulf %95, %96 : vector<8x32xf32>
      %98 = arith.mulf %90, %90 : vector<8x32xf32>
      %99 = arith.subf %97, %98 : vector<8x32xf32>
      %c0_55 = arith.constant 0 : index
      %c0_56 = arith.constant 0 : index
      %c0_57 = arith.constant 0 : index
      %100 = vector.load %arg8[%c0_55, %c0_56, %c0_57] : memref<1x8x32xf32, #tpu.memory_space<vmem>>, vector<1x8x32xf32>
      %101 = vector.shape_cast %100 : vector<1x8x32xf32> to vector<8x32xf32>
      %102 = vector.shape_cast %90 : vector<8x32xf32> to vector<1x8x32xf32>
      tpu.vector_store %arg8[%c0_55, %c0_56, %c0_57], %102 {strides = array<i32>} : memref<1x8x32xf32, #tpu.memory_space<vmem>>, vector<1x8x32xf32>,
      %c0_58 = arith.constant 0 : index
      %c0_59 = arith.constant 0 : index
      %c0_60 = arith.constant 0 : index
      %103 = vector.load %arg9[%c0_58, %c0_59, %c0_60] : memref<1x8x32xf32, #tpu.memory_space<vmem>>, vector<1x8x32xf32>
      %104 = vector.shape_cast %103 : vector<1x8x32xf32> to vector<8x32xf32>
      %105 = vector.shape_cast %99 : vector<8x32xf32> to vector<1x8x32xf32>
      tpu.vector_store %arg9[%c0_58, %c0_59, %c0_60], %105 {strides = array<i32>} : memref<1x8x32xf32, #tpu.memory_space<vmem>>, vector<1x8x32xf32>,
    } else {
    }
    return
  }
  func.func @transform_0(%arg0: i32, %arg1: i32, %arg2: i32) -> (i32, i32, i32) {
    %c0_i32 = arith.constant 0 : i32
    %c0_i32_0 = arith.constant 0 : i32
    return %arg0, %arg2, %c0_i32 : i32, i32, i32
  }
  func.func @transform_1(%arg0: i32, %arg1: i32, %arg2: i32) -> (i32, i32, i32) {
    %c0_i32 = arith.constant 0 : i32
    %c0_i32_0 = arith.constant 0 : i32
    return %arg0, %c0_i32, %arg2 : i32, i32, i32
  }
  func.func @transform_2(%arg0: i32, %arg1: i32, %arg2: i32) -> (i32, i32) {
    %c0_i32 = arith.constant 0 : i32
    %c0_i32_0 = arith.constant 0 : i32
    %c0_i32_1 = arith.constant 0 : i32
    return %c0_i32, %c0_i32_0 : i32, i32
  }
  func.func @transform_3(%arg0: i32, %arg1: i32, %arg2: i32) -> (i32, i32) {
    %c0_i32 = arith.constant 0 : i32
    %c0_i32_0 = arith.constant 0 : i32
    %c0_i32_1 = arith.constant 0 : i32
    return %c0_i32, %c0_i32_0 : i32, i32
  }
  func.func @transform_4(%arg0: i32, %arg1: i32, %arg2: i32) -> (i32, i32, i32) {
    %c0_i32 = arith.constant 0 : i32
    %c0_i32_0 = arith.constant 0 : i32
    %c0_i32_1 = arith.constant 0 : i32
    return %arg0, %c0_i32, %c0_i32_0 : i32, i32, i32
  }
  func.func @transform_5(%arg0: i32, %arg1: i32, %arg2: i32) -> (i32, i32, i32) {
    %c0_i32 = arith.constant 0 : i32
    %c0_i32_0 = arith.constant 0 : i32
    %c0_i32_1 = arith.constant 0 : i32
    return %arg0, %c0_i32, %c0_i32_0 : i32, i32, i32
  }
  func.func @transform_6(%arg0: i32, %arg1: i32, %arg2: i32) -> (i32, i32, i32) {
    %c0_i32 = arith.constant 0 : i32
    %c0_i32_0 = arith.constant 0 : i32
    %c0_i32_1 = arith.constant 0 : i32
    return %arg0, %c0_i32, %c0_i32_0 : i32, i32, i32
  }
  func.func @transform_7(%arg0: i32, %arg1: i32, %arg2: i32) -> (i32, i32, i32) {
    %c0_i32 = arith.constant 0 : i32
    %c0_i32_0 = arith.constant 0 : i32
    return %arg0, %c0_i32, %arg2 : i32, i32, i32
  }
}

</mosaic_0001>

<bundles_post_ra>
// kernel: tpu_custom_call.1
= control target key start
LH: loop header
LB: loop body
LE: loop exit
PB: predicated region body
PF: predicated region fallthrough
CT: control target
= control target key end

     0   :  { %13 = vsyncpa [#allocation5], 0  ;;  %s1559_s0 = inlined_call_operand.vmem [shape: f32[2,64,32], index: 0, kind: input, shape index: {}]   ;;  %s1560_s1 = inlined_call_operand.vmem [shape: f32[2,1,64], index: 1, kind: input, shape index: {}]   ;;  %s1561_s2 = inlined_call_operand.vmem [shape: f32[8,32], index: 2, kind: input, shape index: {}]   ;;  %s1562_s3 = inlined_call_operand.vmem [shape: f32[8,32], index: 3, kind: input, shape index: {}]   ;;  %s1563_s4 = inlined_call_operand.vmem [shape: f32[2,8,1], index: 4, kind: output, shape index: {0}]   ;;  %s1564_s5 = inlined_call_operand.hbm [shape: f32[2,8,32], index: 5, kind: output, shape index: {1}]   ;;  %s1565_s6 = inlined_call_operand.hbm [shape: f32[2,8,32], index: 6, kind: output, shape index: {2}]   ;;  %s1566_s7 = inlined_call_operand.hbm [shape: f32[2,8,64], index: 7, kind: output, shape index: {3}]  }
   0x1   :  { %15 = vsyncpa [#allocation5 + $0x1], 0 }
   0x2   :  { %16 = vsyncpa [#allocation7], 0 }
   0x3   :  { %18 = vsyncpa [#allocation7 + $0x1], 0  ;;  %s1256_s24 = smov 0   ;;  %s1258_s25 = smov 0  }
   0x4   :  { %s1260_s26 = smov 0   ;;  %s1262_s27 = smov 0  }
   0x5   :  { %s1264_s28 = smov 0   ;;  %s1266_s29 = smov 0  }
   0x6   :  { %s1268_s30 = smov 0   ;;  %s1270_s8 = smov 0  }
   0x7 LB: > { %1573 = sst [smem:[#allocation11_spill]] %s1201_s29  ;;  %s1568_s9 = sadd.s32 4294967295, %s1209_s8   ;;  %s1209_s8 = sphi %s1270_s8, %s24_s8   ;;  %s1205_s30 = sphi %s1268_s30, %s1587_s30   ;;  %s1201_s29 = sphi %s1266_s29, %s1586_s29   ;;  %s1197_s28 = sphi %s1264_s28, %s1585_s28   ;;  %s1193_s27 = sphi %s1262_s27, %s1584_s27   ;;  %s1189_s26 = sphi %s1260_s26, %s1590_s26   ;;  %s1185_s25 = sphi %s1258_s25, %s1589_s25   ;;  %s1181_s24 = sphi %s1256_s24, %s1588_s24  }
   0x8   : > { %1574 = sst [smem:[#allocation12_spill]] %s1205_s30  ;;  %s1567_s10 = sadd.s32 4294967294, %s1209_s8  }
   0x9   : > { %s39_s11 = sadd.s32 1, %s1201_s29  ;;  %s43_s12 = sadd.s32 1, %s1205_s30 }
   0xa   : > { %p41_p0 = scmp.ge.s32.totalorder %s39_s11, 3  ;;  %p184_p1 = scmp.ne.s32.totalorder %s1189_s26, %s1185_s25 }
   0xb   : > { %p185_p2 = scmp.eq.s32.totalorder %s1568_s9, 5  ;;  %p190_p4 = scmp.ne.s32.totalorder %s1185_s25, %s1181_s24 }
   0xc   : > { %s1592_s11 = smov (%p41_p0, %s39_s11), 0  ;;  %s1594_s12 = smov (!%p41_p0, %s43_s12), %s1205_s30 }
   0xd   : > { %1575 = sst [smem:[#allocation13_spill]] %s1592_s11  ;;  %p1307_p3 = por %p185_p2, %p184_p1 }
   0xe   : > { %p45_p5 = scmp.ge.s32.totalorder %s1594_s12, 2  ;;  %p191_p6 = scmp.eq.s32.totalorder %s1567_s10, 5 }
   0xf   : > { %p924_p7 = scmp.ge.s32.totalorder %s1209_s8, 1  ;;  %p291_p8 = scmp.lt.s32.totalorder %s1209_s8, 7 }
  0x10   : > { %s1596_s12 = smov (%p45_p5, %s1594_s12), 0  ;;  %p1319_p9 = por %p191_p6, %p190_p4 }
  0x11   : > { %1577 = sst [smem:[#allocation14_spill]] %s1596_s12  ;;  %p292_p10 = pnand %p924_p7, %p291_p8 }
  0x12   : > { %s171_s15 = ssub.s32 %s1205_s30, %s1596_s12  ;;  %s174_s16 = sadd.s32 1, %s1189_s26 }
  0x13   : > { %p172_p11 = scmp.eq.s32.totalorder %s171_s15, 0  ;;  %295 = sbr.rel (%p292_p10) target bundleno = 889 (0x379), region = 36 }
  0x14   : > { %s1569_s18 = sand.u32 (!%p292_p10), 1, %s1185_s25   ;;  %p348_p12 = scmp.lt.s32.totalorder (!%p292_p10), %s1197_s28, 1 }
  0x15   : > { %s1327_s17 = scalar_select %p172_p11, %s1189_s26, %s174_s16  }
  0x16   : > { %s1333_s19 = sshll.u32 (!%p292_p10), %s1569_s18, 3  ;;  %p367_p13 = scmp.eq.s32.totalorder (!%p292_p10), %s1193_s27, 0 }
  0x17   : > { %1579 = sst [smem:[#allocation15_spill]] %s1327_s17  ;;  %s1356_s30 = scalar_lea.vmem (!%p292_p10), [#allocation4], %s1333_s19 }
  0x18   : > { %s1337_s20 = scalar_select %p348_p12, %s1197_s28, 1  ;;  %vm373_vm0 = vcmask (%p367_p13), 7168   ;;  %v375_v0 = vld [vmem:[%s1561_s2] sm:$0xff] (%p367_p13)  ;;  %vm376_vm1 = vcmask (%p367_p13), 261120   ;;  %v1211_v2 = vmov (%p367_p13), 0.125  }
  0x19   : > { %s1359_s29 = scalar_lea.vmem [#allocation6], %s1333_s19  ;;  %s346_s17 = scalar_lea.vmem [#allocation8], %s1333_s19  ;;  %v378_v1 = vld [vmem:[%s1562_s3] sm:$0xff] (%p367_p13)  ;;  %377 = vst.msk [vmem:[%s1356_s30] sm:$0xff] (%p367_p13), %vm376_vm1, %v375_v0 }
  0x1a   : > { %s950_s21 = sshll.u32 %s1337_s20, 6  ;;  %s362_s15 = scalar_lea.vmem %s1560_s1, %s1337_s20  ;;  %379 = vst.msk [vmem:[%s1359_s29] sm:$0xff] (%p367_p13), %vm376_vm1, %v378_v1 }
  0x1b   : > { %s1347_s9 = scalar_lea.vmem %s1559_s0, %s950_s21  ;;  %s930_s18 = sshll.u32 %s1337_s20, 3 }
  0x1c   : > { %s1353_s27 = scalar_lea.vmem %s1563_s4, %s930_s18  ;;  %372 = sbr.rel (!%p367_p13) target bundleno = 33 (0x21), region = 40 }
  0x1d   : > { %374 = vst.msk [vmem:[%s1353_s27] sm:$0xff] (%p367_p13), %vm373_vm0, %v1211_v2 }
  0x21 PF: > { %v394_v3 = vld [vmem:[%s1347_s9 + $0x38] sm:$0xff]  ;;  %v1373_v4 = vld [vmem:[%s1347_s9 + $0x28] sm:$0xff]  ;;  %s1212_s11 = smov 32   ;;  %v393_v10 = vld [vmem:[%s1347_s9 + $0x30] sm:$0xff]  ;;  %vm436_vm6 = vcmask 261120   ;;  %vm385_vm7 = vcmask 523264  }
  0x22   : > { %v403_v5 = vmul.f32 %v394_v3, %v394_v3  ;;  %v401_v6 = vmul.f32 %v1373_v4, %v1373_v4  ;;  %v1378_v7 = vld [vmem:[%s1347_s9 + $0x18] sm:$0xff]  ;;  %v447_v9 = vld [vmem:[%s1359_s29] sm:$0xff]  ;;  %v1389_v12 = vld [vmem:[%s1347_s9 + $0x10] sm:$0xff]  ;;  %v402_v13 = vmul.f32 %v393_v10, %v393_v10  ;;  %v1213_v38 = vmov 0   ;;  %s1460_s22 = sshll.u32 %s1197_s28, 3  ;;  %s1580_s12 = sand.u32 1, %s1185_s25  }
  0x23   : > { %v399_v8 = vmul.f32 %v1378_v7, %v1378_v7  ;;  %v391_v11 = vld [vmem:[%s1347_s9 + $0x20] sm:$0xff]  ;;  %1041 = vrcp.f32 %v447_v9  ;;  %v398_v15 = vmul.f32 %v1389_v12, %v1389_v12  ;;  %v388_v18 = vld [vmem:[%s1347_s9 + $0x8] sm:$0xff]  ;;  %v459_v20 = vand.u32 2147483648, %v447_v9  ;;  %v446_v32 = vld [vmem:[%s1356_s30] sm:$0xff]  ;;  %1038 = vset.pattern.permute.xlu1 %v1213_v38  ;;  %1039 = vset.pattern.permute.xlu0 %v1213_v38  ;;  %s707_s21 = scalar_lea.hbm %s1564_s5, %s1460_s22  ;;  %s684_s18 = scalar_lea.sflag [#allocation5], %s1580_s12 }
  0x24   : > { %426 = vrot.lane.b32.xlu0 %v403_v5, %s1212_s11  ;;  %422 = vrot.lane.b32.xlu1 %v401_v6, %s1212_s11  ;;  %v400_v14 = vmul.f32 %v391_v11, %v391_v11  ;;  %v1397_v19 = vld [vmem:[%s1347_s9] sm:$0xff]  ;;  %vm453_vm2 = vweird.f32 %v447_v9  ;;  %v457_v22 = vand.u32 2147483647, %v447_v9  ;;  %v397_v23 = vmul.f32 %v388_v18, %v388_v18  ;;  %s711_s9 = sshll.u32 %s707_s21, 4  ;;  %s1075_s16 = scalar_lea.hbm %s1564_s5, 16  ;;  %s712_s9 = int_to_ptr.hbm [resolvable:$true] %s711_s9 }
  0x25   : > { %418 = vrot.lane.b32.xlu2 %v399_v8, %s1212_s11  ;;  %v396_v24 = vmul.f32 %v1397_v19, %v1397_v19  ;;  %v460_v26 = vor.u32 1.1754944e-38, %v459_v20  ;;  %1043 = vlog2.f32 %v447_v9  ;;  %v472_v34 = vmul.f32 %v446_v32, %v446_v32  ;;  %v445_v36 = vld [vmem:[%s1353_s27] sm:$0xff]  ;;  %s1069_s20 = sshra.s32 %s712_s9, 4  ;;  %s1070_s20 = int_to_ptr.hbm [resolvable:$true] %s1069_s20 }
  0x26   : > { %vm458_vm5 = vcmp.eq.f32.partialorder %v457_v22, 8.507059e+37  ;;  %1045 = vlog2.f32 %v445_v36  ;;  %v463_v57 = vmul.f32 -2.0, %v446_v32  ;;  %vm383_vm12 = vcmask 7168   ;;  %p1076_p4 = scmp.lt.s32.totalorder %s1070_s20, %s1564_s5 }
  0x29   : > { %v1042_v16 = vpop.eup %1041 }
  0x2a   : > { %v449_v17 = vmul.f32 %v1042_v16, %v447_v9  ;;  %vm454_vm3 = vweird.f32 %v1042_v16 }
  0x2b   : > { %vm455_vm4 = vmor %vm453_vm2, %vm454_vm3  ;;  %v1044_v39 = vpop.eup %1043 }
  0x2c   : > { %424 = vrot.lane.b32.xlu0 %v402_v13, %s1212_s11  ;;  %420 = vrot.lane.b32.xlu1 %v400_v14, %s1212_s11  ;;  %v450_v21 = vsub.f32 1.0, %v449_v17  ;;  %v471_v42 = vmul.f32 0.6931472, %v1044_v39  ;;  %v1046_v47 = vpop.eup %1045 }
  0x2d   : > { %416 = vrot.lane.b32.xlu2 %v398_v15, %s1212_s11  ;;  %v530_v51 = vmul.f32 0.6931472, %v1046_v47 }
  0x2e   : > { %v451_v25 = vmul.f32 %v1042_v16, %v450_v21 }
  0x30   : > { %v452_v27 = vadd.f32 %v1042_v16, %v451_v25 }
  0x32   : > { %v456_v28 = vsel %vm455_vm4, %v1042_v16, %v452_v27 }
  0x33   : > { %v461_v29 = vsel %vm458_vm5, %v460_v26, %v456_v28 }
  0x34   : > { %414 = vrot.lane.b32.xlu0 %v397_v23, %s1212_s11  ;;  %412 = vrot.lane.b32.xlu1 %v396_v24, %s1212_s11  ;;  %v473_v37 = vmul.f32 %v472_v34, %v461_v29  ;;  %v464_v58 = vmul.f32 %v463_v57, %v461_v29 }
  0x35   : > { %466 = vrot.lane.b32.xlu2 %v461_v29, %s1212_s11 }
  0x36   : > { %v474_v44 = vadd.f32 %v473_v37, %v471_v42 }
  0x38   : > { %v475_v49 = vsel %vm436_vm6, %v474_v44, 0.0 }
  0x3c   : > { %533 = vperm.xlu1 %1038, %v530_v51  }
  0x5e   : > { %476 = vadd.xlane.f32.xlu0 %v475_v49 }
  0x7f   : > { %v419_v35 = vpop.permute.xlu2 %418 }
  0x80   : > { %v440_v50 = vsel %vm436_vm6, %v1378_v7, %v419_v35  ;;  %v1214_v35 = vmov 0.0  }
  0x81   : > { %384 = vst.msk [vmem:[#allocation2] sm:$0xff] %vm383_vm12, %v1214_v35 }
  0x82   : > { %386 = vst.msk [vmem:[#allocation3] sm:$0xff] %vm385_vm7, %v1214_v35 }
  0x87   : > { %v417_v48 = vpop.permute.xlu2 %416 }
  0x88   : > { %v439_v52 = vsel %vm436_vm6, %v1389_v12, %v417_v48  ;;  %v574_v36 = vld [vmem:[#allocation2] sm:$0xff] }
  0x89   : > { %v581_v39 = vld [vmem:[#allocation3] sm:$0xff] }
  0x8f   : > { %v467_v59 = vpop.permute.xlu2 %466 }
  0x90   : > { %v469_v60 = vsel %vm436_vm6, %v464_v58, %v467_v59 }
  0x96   : > { %v427_v30 = vpop.permute.xlu0 %426  ;;  %v423_v31 = vpop.permute.xlu1 %422 }
  0x97   : > { %v444_v33 = vsel %vm436_vm6, %v394_v3, %v427_v30  ;;  %v442_v45 = vsel %vm436_vm6, %v1373_v4, %v423_v31  ;;  %v1040_v30 = vld [vmem:[%s362_s15] ss:$0 sm:$0xff]  ;;  %s1071_s15 = scalar_lea.hbm %s1070_s20, 8 }
  0x98   : > { %932 = vmatpush.xpose.msk.msra.mxu0 %vm385_vm7, %v444_v33  ;;  %593 = vmatpush.msra.mxu1 %v444_v33  ;;  %p1072_p0 = scmp.ne.s32.totalorder %s1070_s20, %s1071_s15  ;;  %p1077_p5 = scmp.lt.s32.totalorder %s1075_s16, %s1071_s15 }
  0x9a   : > { %p1073_p1 = pnand %p1072_p0, %p1307_p3  ;;  %p1078_p6 = por %p1077_p5, %p1076_p4 }
  0x9c   : > { %p1074_p2 = pneg %p1073_p1 }
  0x9e   : > { %v425_v40 = vpop.permute.xlu0 %424  ;;  %v421_v41 = vpop.permute.xlu1 %420  ;;  %p1079_p7 = pnand %p1078_p6, %p1074_p2 }
  0x9f   : > { %v443_v43 = vsel %vm436_vm6, %v393_v10, %v425_v40  ;;  %v441_v46 = vsel %vm436_vm6, %v391_v11, %v421_v41 }
  0xa0   : > { %933 = vmatpush.xpose.msk.msra.mxu0 %vm385_vm7, %v443_v43  ;;  %594 = vmatpush.msra.mxu1 %v443_v43 }
  0xa2   : > { %595 = vmatpush.msra.mxu1 %v442_v45 }
  0xa4   : > { %934 = vmatpush.xpose.msk.msra.mxu0 %vm385_vm7, %v442_v45  ;;  %596 = vmatpush.msra.mxu1 %v441_v46 }
  0xa6   : > { %597 = vmatpush.msra.mxu1 %v440_v50  ;;  %v415_v53 = vpop.permute.xlu0 %414  ;;  %v413_v54 = vpop.permute.xlu1 %412 }
  0xa7   : > { %v438_v55 = vsel %vm436_vm6, %v388_v18, %v415_v53  ;;  %v437_v56 = vsel %vm436_vm6, %v1397_v19, %v413_v54 }
  0xa8   : > { %935 = vmatpush.xpose.msk.msra.mxu0 %vm385_vm7, %v441_v46  ;;  %598 = vmatpush.msra.mxu1 %v439_v52 }
  0xaa   : > { %599 = vmatpush.msra.mxu1 %v438_v55 }
  0xac   : > { %936 = vmatpush.xpose.msk.msra.mxu0 %vm385_vm7, %v440_v50  ;;  %600 = vmatpush.msra.mxu1 %v437_v56 }
  0xae   : > { %v534_v1 = vpop.permute.xlu1 %533 }
  0xb0   : > { %937 = vmatpush.xpose.msk.msra.mxu0 %vm385_vm7, %v439_v52 }
  0xb4   : > { %938 = vmatpush.xpose.msk.msra.mxu0 %vm385_vm7, %v438_v55 }
  0xb8   : > { %939 = vmatpush.xpose.msk.msra.mxu0 %vm385_vm7, %v437_v56 }
  0xbb   : > { %940 = vmatmul.msk.f32.vlgmr.msra.gmra.mxu0 %vm385_vm7, %v469_v60 }
  0xd1   : > { %v477_v61 = vpop.xlane.xlu0 %476 }
  0xd2   : > { %v526_v62 = vadd.f32 58.812065, %v477_v61  ;;  %v610_v61 = vld [vmem:[%s1561_s2] sm:$0xff] }
 0x138   : > { %v523_v63 = vpop.f32.mrf.mxu0 }
 0x139   : > { %v527_v0 = vadd.f32 %v526_v62, %v523_v63  ;;  %v659_v62 = vmul.f32 %v610_v61, %v610_v61 }
 0x13b   : > { %v528_v2 = vmul.f32 -0.5, %v527_v0  ;;  %v611_v0 = vld [vmem:[%s1562_s3] sm:$0xff] }
 0x13d   : > { %v536_v3 = vadd.f32 %v534_v1, %v528_v2 }
 0x13f   : > { %v537_v4 = vsel %vm385_vm7, %v536_v3, -inf }
 0x140   : > { %v538_v5 = vrot.slane %v537_v4, 4 }
 0x142   : > { %v539_v6 = vmax.f32 %v537_v4, %v538_v5 }
 0x144   : > { %v540_v7 = vrot.slane %v539_v6, 2 }
 0x146   : > { %v541_v8 = vmax.f32 %v539_v6, %v540_v7 }
 0x148   : > { %v542_v9 = vrot.slane %v541_v8, 1 }
 0x14a   : > { %v543_v10 = vmax.f32 %v541_v8, %v542_v9 }
 0x14c   : > { %v544_v11 = vsub.f32 %v536_v3, %v543_v10  ;;  %v660_v3 = vadd.f32 %v659_v62, %v611_v0 }
 0x14e   : > { %v545_v12 = vmul.f32 1.442695, %v544_v11 }
 0x150   : > { %1047 = vpow2.f32 %v545_v12 }
 0x156   : > { %v1048_v13 = vpop.eup %1047 }
 0x157   : > { %v547_v14 = vsel %vm385_vm7, %v1048_v13, 0.0 }
 0x158   : > { %v548_v15 = vrot.slane %v547_v14, 4 }
 0x15a   : > { %v549_v16 = vadd.f32 %v548_v15, %v547_v14 }
 0x15c   : > { %v550_v17 = vrot.slane %v549_v16, 2 }
 0x15e   : > { %v551_v18 = vadd.f32 %v550_v17, %v549_v16 }
 0x160   : > { %v552_v19 = vrot.slane %v551_v18, 1 }
 0x162   : > { %v553_v20 = vadd.f32 %v552_v19, %v551_v18 }
 0x164   : > { %1049 = vrcp.f32 %v553_v20  ;;  %v565_v24 = vand.u32 2147483648, %v553_v20  ;;  %v563_v26 = vand.u32 2147483647, %v553_v20  ;;  %vm559_vm9 = vweird.f32 %v553_v20 }
 0x166   : > { %v566_v28 = vor.u32 1.1754944e-38, %v565_v24  ;;  %vm564_vm11 = vcmp.eq.f32.partialorder %v563_v26, 8.507059e+37 }
 0x16a   : > { %v1050_v21 = vpop.eup %1049 }
 0x16b   : > { %v555_v22 = vmul.f32 %v1050_v21, %v553_v20  ;;  %vm560_vm8 = vweird.f32 %v1050_v21 }
 0x16c   : > { %vm561_vm10 = vmor %vm559_vm9, %vm560_vm8 }
 0x16d   : > { %v556_v23 = vsub.f32 1.0, %v555_v22 }
 0x16f   : > { %v557_v25 = vmul.f32 %v1050_v21, %v556_v23 }
 0x171   : > { %v558_v27 = vadd.f32 %v1050_v21, %v557_v25 }
 0x173   : > { %v562_v29 = vsel %vm561_vm10, %v1050_v21, %v558_v27 }
 0x174   : > { %v567_v31 = vsel %vm564_vm11, %v566_v28, %v562_v29 }
 0x175   : > { %v568_v32 = vmul.f32 %v1048_v13, %v567_v31 }
 0x177   : > { %v572_v33 = vmul.f32 %v1040_v30, %v568_v32 }
 0x179   : > { %941 = vmatmul.msk.f32.vlgmr.msra.gmra.mxu1 %vm385_vm7, %v572_v33  ;;  %573 = vst.msk [vmem:[%s346_s17] sm:$0xff] %vm385_vm7, %v572_v33  ;;  %v575_v34 = vsel %vm385_vm7, %v572_v33, 0.0 }
 0x17a   : > { %576 = vadd.xlane.f32.xlu2 %v575_v34 }
 0x1ed   : > { %v577_v37 = vpop.xlane.xlu2 %576 }
 0x1ee   : > { %v578_v38 = vadd.f32 %v577_v37, %v574_v36 }
 0x1f0   : > { %580 = vst.msk [vmem:[#allocation2] sm:$0xff] %vm383_vm12, %v578_v38 }
 0x1f6   : > { %v602_v40 = vpop.f32.mrf.mxu1 }
 0x1f7   : > { %v612_v41 = vld [vmem:[#allocation2] sm:$0xff]  ;;  %v605_v42 = vadd.f32 %v602_v40, %v581_v39 }
 0x1f8   : > { %v613_v43 = vadd.f32 1.0, %v612_v41 }
 0x1f9   : > { %606 = vst.msk [vmem:[#allocation3] sm:$0xff] %vm385_vm7, %v605_v42 }
 0x1fa   : > { %v628_v44 = vsel %vm383_vm12, %v613_v43, 0.0  ;;  %1051 = vrcp.f32 %v613_v43  ;;  %v625_v55 = vand.u32 2147483648, %v613_v43  ;;  %v623_v56 = vand.u32 2147483647, %v613_v43 }
 0x1fb   : > { %v629_v45 = vrot.slane %v628_v44, 4  ;;  %vm619_vm14 = vweird.f32 %v613_v43 }
 0x1fc   : > { %v626_v58 = vor.u32 1.1754944e-38, %v625_v55  ;;  %vm624_vm0 = vcmp.eq.f32.partialorder %v623_v56, 8.507059e+37 }
 0x1fd   : > { %v630_v46 = vadd.f32 %v629_v45, %v628_v44 }
 0x1ff   : > { %v631_v47 = vrot.slane %v630_v46, 2 }
 0x200   : > { %v1052_v48 = vpop.eup %1051  ;;  %v651_v12 = vld [vmem:[#allocation3] sm:$0xff] }
 0x201   : > { %v632_v49 = vadd.f32 %v631_v47, %v630_v46  ;;  %v615_v50 = vmul.f32 %v1052_v48, %v613_v43  ;;  %vm620_vm13 = vweird.f32 %v1052_v48  ;;  %v652_v13 = vadd.f32 %v651_v12, %v610_v61 }
 0x202   : > { %vm621_vm15 = vmor %vm619_vm14, %vm620_vm13 }
 0x203   : > { %v633_v51 = vrot.slane %v632_v49, 1  ;;  %v616_v52 = vsub.f32 1.0, %v615_v50 }
 0x205   : > { %v634_v53 = vadd.f32 %v633_v51, %v632_v49  ;;  %v617_v54 = vmul.f32 %v1052_v48, %v616_v52 }
 0x207   : > { %1053 = vrcp.f32 %v634_v53  ;;  %v618_v57 = vadd.f32 %v1052_v48, %v617_v54  ;;  %v646_v4 = vand.u32 2147483648, %v634_v53  ;;  %v644_v6 = vand.u32 2147483647, %v634_v53 }
 0x208   : > { %vm640_vm2 = vweird.f32 %v634_v53 }
 0x209   : > { %v622_v59 = vsel %vm621_vm15, %v1052_v48, %v618_v57  ;;  %v647_v8 = vor.u32 1.1754944e-38, %v646_v4  ;;  %vm645_vm4 = vcmp.eq.f32.partialorder %v644_v6, 8.507059e+37 }
 0x20a   : > { %v627_v60 = vsel %vm624_vm0, %v626_v58, %v622_v59 }
 0x20b   : > { %655 = vperm.xlu1 %1038, %v627_v60  }
 0x20d   : > { %v1054_v63 = vpop.eup %1053 }
 0x20e   : > { %v636_v1 = vmul.f32 %v1054_v63, %v634_v53  ;;  %vm641_vm1 = vweird.f32 %v1054_v63 }
 0x20f   : > { %vm642_vm3 = vmor %vm640_vm2, %vm641_vm1 }
 0x210   : > { %v637_v2 = vsub.f32 1.0, %v636_v1 }
 0x212   : > { %v638_v5 = vmul.f32 %v1054_v63, %v637_v2 }
 0x213   : > { %662 = vrot.lane.b32.xlu1 %v660_v3, %s1212_s11 }
 0x214   : > { %v639_v7 = vadd.f32 %v1054_v63, %v638_v5 }
 0x216   : > { %v643_v9 = vsel %vm642_vm3, %v1054_v63, %v639_v7 }
 0x217   : > { %v648_v10 = vsel %vm645_vm4, %v647_v8, %v643_v9 }
 0x218   : > { %v649_v11 = vmul.f32 %v648_v10, %v613_v43 }
 0x21a   : > { %650 = vst.msk [vmem:[%s1353_s27] sm:$0xff] %vm383_vm12, %v649_v11  ;;  %s709_s27 = sshll.u32 %s1356_s30, 4  ;;  %s710_s27 = int_to_ptr.vmem [resolvable:$true] %s709_s27 }
 0x27d   : > { %v656_v14 = vpop.permute.xlu1 %655 }
 0x27e   : > { %v658_v15 = vmul.f32 %v656_v14, %v652_v13 }
 0x280   : > { %v667_v16 = vmul.f32 %v658_v15, %v658_v15  ;;  %673 = vst.msk [vmem:[%s1356_s30] sm:$0xff] %vm436_vm6, %v658_v15 }
 0x282   : > { %669 = vrot.lane.b32.xlu1 %v667_v16, %s1212_s11 }
 0x285   : > { %v663_v17 = vpop.permute.xlu1 %662 }
 0x286   : > { %v665_v18 = vadd.f32 %v663_v17, %v651_v12 }
 0x287   : > { %1082 = shalt.err (!%p1079_p7)
}
 0x288   : > { %952 = dma.vmem_to_hbm [thread:$0]  (%p1307_p3), %s710_s27, 128, %s712_s9, %s684_s18   ;;  %v666_v19 = vmul.f32 %v665_v18, %v656_v14 }
 0x289   : > { %s1215_s30 = smov 96   ;;  %s721_s20 = scalar_lea.hbm %s1565_s6, %s1460_s22 }
 0x28a   : > { %s736_s11 = scalar_lea.hbm %s1566_s7, %s1460_s22  ;;  %s1581_s16 = sadd.s32 4294967295, %s1209_s8  }
 0x28b   : > { %s1489_s23 = sand.u32 1, %s1581_s16   ;;  %s723_s27 = sshll.u32 %s1359_s29, 4  ;;  %s724_s27 = int_to_ptr.vmem [resolvable:$true] %s723_s27 }
 0x28c   : > { %s725_s9 = sshll.u32 %s721_s20, 4  ;;  %s1494_s18 = sshll.u32 %s346_s17, 4  ;;  %s726_s9 = int_to_ptr.hbm [resolvable:$true] %s725_s9  ;;  %s739_s18 = int_to_ptr.vmem [resolvable:$true] %s1494_s18 }
 0x28d   : > { %s1496_s10 = sshll.u32 %s736_s11, 4  ;;  %s689_s22 = scalar_lea.sflag [#allocation7], %s1489_s23  ;;  %s741_s10 = int_to_ptr.hbm [resolvable:$true] %s1496_s10 }
 0x28e   : > { %s1103_s12 = scalar_lea.hbm %s1565_s6, 16 }
 0x2f4   : > { %v670_v20 = vpop.permute.xlu1 %669 }
 0x2f5   : > { %v672_v21 = vsub.f32 %v666_v19, %v670_v20 }
 0x2f7   : > { %675 = vrot.lane.b32.xlu1 %v672_v21, %s1215_s30  ;;  %s1097_s30 = sshra.s32 %s726_s9, 4  ;;  %s1098_s30 = int_to_ptr.hbm [resolvable:$true] %s1097_s30 }
 0x2f8   : > { %s1099_s21 = scalar_lea.hbm %s1098_s30, 8  ;;  %p1104_p12 = scmp.lt.s32.totalorder %s1098_s30, %s1565_s6 }
 0x2f9   : > { %p1100_p8 = scmp.ne.s32.totalorder %s1098_s30, %s1099_s21  ;;  %p1105_p13 = scmp.lt.s32.totalorder %s1103_s12, %s1099_s21 }
 0x2fb   : > { %p1101_p10 = pnand %p1100_p8, %p1307_p3  ;;  %p1106_p0 = por %p1105_p13, %p1104_p12 }
 0x2fd   : > { %p1102_p11 = pneg %p1101_p10 }
 0x2ff   : > { %p1107_p1 = pnand %p1106_p0, %p1102_p11 }
 0x369   : > { %v676_v22 = vpop.permute.xlu1 %675 }
 0x36a   : > { %678 = vst.msk [vmem:[%s1359_s29] sm:$0xff] %vm436_vm6, %v676_v22 }
 0x36b   : > { %1110 = shalt.err (!%p1107_p1)
}
 0x36c   : > { %953 = dma.vmem_to_hbm [thread:$0]  (%p1307_p3), %s724_s27, 128, %s726_s9, %s689_s22  }
 0x36d   : > { %s1125_s29 = sshra.s32 %s741_s10, 4  ;;  %s1131_s23 = scalar_lea.hbm %s1566_s7, 16  ;;  %s1126_s29 = int_to_ptr.hbm [resolvable:$true] %s1125_s29 }
 0x36e   : > { %s1127_s28 = scalar_lea.hbm %s1126_s29, 8  ;;  %p1132_p6 = scmp.lt.s32.totalorder %s1126_s29, %s1566_s7 }
 0x36f   : > { %p1128_p2 = scmp.ne.s32.totalorder %s1126_s29, %s1127_s28  ;;  %p1133_p7 = scmp.lt.s32.totalorder %s1131_s23, %s1127_s28 }
 0x371   : > { %p1129_p4 = pnand %p1128_p2, %p1307_p3  ;;  %p1134_p8 = por %p1133_p7, %p1132_p6 }
 0x373   : > { %p1130_p5 = pneg %p1129_p4 }
 0x375   : > { %p1135_p10 = pnand %p1134_p8, %p1130_p5 }
 0x377   : > { %1138 = shalt.err (!%p1135_p10)
}
 0x378   : > { %954 = dma.vmem_to_hbm [thread:$0]  (%p1307_p3), %s739_s18, 128, %s741_s10, %s689_s22  }
 0x379 PF: > { %p968_p11 = scmp.ge.s32.totalorder %s1209_s8, 2  ;;  %s759_s27 = sand.u32 1, %s1181_s24  }
 0x37a   : > { %s760_s9 = scalar_lea.sflag [#allocation5], %s759_s27 }
 0x37b   : > { %p959_p12 = pnand %p968_p11, %p1319_p9 }
 0x37d   : > { %p960_p13 = pneg %p959_p12 }
 0x37f   : > { %1172 = dma.done.wait (%p960_p13), %s760_s9, 128  }
 0x380   : > { %1174 = vsyncadd (%p960_p13), %s760_s9, 4294967168  ;;  %s1582_s17 = sadd.s32 4294967294, %s1209_s8  }
 0x381   : > { %s769_s13 = sand.u32 1, %s1582_s17  }
 0x382   : > { %s770_s19 = scalar_lea.sflag [#allocation7], %s769_s13 }
 0x383   : > { %1176 = dma.done.wait (%p960_p13), %s770_s19, 256  }
 0x384   : > { %1178 = vsyncadd (%p960_p13), %s770_s19, 4294967040  ;;  %s24_s8 = sadd.s32 1, %s1209_s8   ;;  %s1583_s18 = sld [smem:[#allocation15_spill]] }
 0x385   : > { %p21_p3 = scmp.ge.s32.totalorder %s24_s8, 8   ;;  %s1584_s27 = sld [smem:[#allocation11_spill]] }
 0x386   : > { %s1585_s28 = sld [smem:[#allocation12_spill]]  ;;  %s1588_s24 = smov %s1185_s25 }
 0x387   : > { %s1586_s29 = sld [smem:[#allocation13_spill]]  ;;  %s1589_s25 = smov %s1189_s26 }
 0x388   : > { %s1587_s30 = sld [smem:[#allocation14_spill]]  ;;  %23 = sbr.rel (!%p21_p3) target bundleno = 7 (0x7), region = 130 }
 0x38a   : > { %s1590_s26 = smov %s1583_s18 }
 0x38d   :  { %786 = vsyncpa [#allocation5], 1 }
 0x38e   :  { %788 = vsyncpa [#allocation5 + $0x1], 1 }
 0x38f   :  { %789 = vsyncpa [#allocation7], 1 }
 0x390   :  { %791 = vsyncpa [#allocation7 + $0x1], 1 }

</bundles_post_ra>
